<compile_context>
chip_gen: v7x
topology: tpu7x:2x2x1
jax: 0.10.0
libtpu: 0.0.40
codegen_flags: <defaults>
</compile_context>

<pallas_src>
import jax
import jax.numpy as jnp
from jax.experimental import pallas as pl
from jax.experimental.pallas import tpu as pltpu


def _spatial_dropout_kernel(mask_ref, x_ref, o_ref):
    # mask_ref: (B, 1, C)  per-(batch, channel) keep * 1/(1-p) mask
    # x_ref/o_ref: (B, T_TILE, C) tile of the (B, T, C) input
    o_ref[...] = (x_ref[...] * mask_ref[...]).astype(o_ref.dtype)


def _sublane_pack(dtype):
    # rows per packed 32-bit sublane word: f32 -> 8, bf16 -> 16, int8/fp8 -> 32
    return max(8, 32 // jnp.dtype(dtype).itemsize)


def spatial_dropout(x, p, key, training=True):
    """Channel-wise (spatial) dropout on x of shape (B, T, C).

    Equivalent to x.permute(0,2,1) -> nn.Dropout2d(p) -> permute(0,2,1):
    each (batch, channel) column is dropped across ALL timesteps with
    probability p; survivors are scaled by 1/(1-p).
    """
    if not training or p == 0.0:
        return x
    if p >= 1.0:
        return jnp.zeros_like(x)

    B, T, C = x.shape

    # --- mask generated once, wrapper-side (hoisted out of the per-tile body) ---
    keep = jax.random.bernoulli(key, 1.0 - p, shape=(B, 1, C))
    mask = (keep.astype(jnp.float32) * (1.0 / (1.0 - p))).astype(x.dtype)

    # --- choose a T tile: big enough to pipeline well, small enough that
    #     2x double-buffered (input + output) blocks fit scoped VMEM on all gens ---
    itemsize = jnp.dtype(x.dtype).itemsize
    pack = _sublane_pack(x.dtype)                  # keep sublane-packed tiles aligned
    target_block_bytes = 2 * 1024 * 1024           # => ~8 MiB total with 2x(in+out)
    rows = max(1, target_block_bytes // (B * C * itemsize))
    t_tile = (rows // pack) * pack
    if t_tile == 0 or t_tile >= T:
        t_tile = T                                 # full-extent block is always legal
    grid = (pl.cdiv(T, t_tile),)

    # TODO(synk): for C not a multiple of 128 the output stores are lane-masked;
    # a wrapper-side relayout to a lane-dense slab would help narrow-C cases.
    return pl.pallas_call(
        _spatial_dropout_kernel,
        out_shape=jax.ShapeDtypeStruct((B, T, C), x.dtype),
        grid=grid,
        in_specs=[
            # mask: same tiny block every grid step (stays resident per step)
            pl.BlockSpec((B, 1, C), lambda t: (0, 0, 0)),
            # x: stream tiles over the sequence axis
            pl.BlockSpec((B, t_tile, C), lambda t: (0, t, 0)),
        ],
        out_specs=pl.BlockSpec((B, t_tile, C), lambda t: (0, t, 0)),
        compiler_params=pltpu.CompilerParams(
            dimension_semantics=("parallel",),     # mask precomputed -> safe to shard T
            vmem_limit_bytes=32 * 1024 * 1024,     # explicit; fits v5e/v6e/v7x scoped VMEM
        ),
    )(mask, x)


if __name__ == "__main__":
    key = jax.random.PRNGKey(0)
    kx, kmask = jax.random.split(key)

    # Small LSTM-style shape: batch=2, seq=8, hidden=32
    B, T, C = 2, 8, 32
    p = 0.5
    x = jax.random.normal(kx, (B, T, C), dtype=jnp.float32)

    out = spatial_dropout(x, p=p, key=kmask, training=True)
    out = jax.block_until_ready(out)

    # Dropout2d semantics: each (b, :, c) column is either all zeros or exactly
    # x[b, :, c] * 1/(1-p).
    scale = 1.0 / (1.0 - p)
    col_zero = jnp.all(out == 0.0, axis=1)                               # (B, C)
    col_scaled = jnp.all(jnp.isclose(out, x * scale, atol=1e-5), axis=1)
    assert bool(jnp.all(col_zero | col_scaled)), "dropout mask not channel-wise"

    # Eval mode is the identity.
    out_eval = spatial_dropout(x, p=p, key=kmask, training=False)
    assert bool(jnp.all(out_eval == x))

    # Larger bf16 shape that actually exercises the tiled T pipeline (grid > 1).
    B2, T2, C2 = 4, 4096, 256
    p2 = 0.3
    x2 = jax.random.normal(kx, (B2, T2, C2), dtype=jnp.bfloat16)
    out2 = jax.block_until_ready(spatial_dropout(x2, p=p2, key=kmask, training=True))
    assert out2.shape == x2.shape

    scale2 = 1.0 / (1.0 - p2)
    x2f = x2.astype(jnp.float32)
    o2f = out2.astype(jnp.float32)
    col_zero2 = jnp.all(o2f == 0.0, axis=1)
    col_scaled2 = jnp.all(
        jnp.abs(o2f - x2f * scale2) <= 0.05 * jnp.abs(x2f * scale2) + 1e-2, axis=1
    )
    assert bool(jnp.all(col_zero2 | col_scaled2)), "tiled path mask not channel-wise"

    print("KERNEL_OK")
</pallas_src>

<mosaic_0001>
module attributes {stable_mosaic.version = 11 : i64} {
  func.func @_spatial_dropout_kernel(%arg0: i32, %arg1: memref<2x1x32xf32, #tpu.memory_space<vmem>>, %arg2: memref<2x8x32xf32, #tpu.memory_space<vmem>>, %arg3: memref<2x8x32xf32, #tpu.memory_space<vmem>>) attributes {dimension_semantics = [#tpu.dimension_semantics<parallel>], iteration_bounds = array<i64: 1>, scalar_prefetch = 0 : i64, scratch_operands = 0 : i64, tpu.core_type = #tpu.core_type<tc>, window_params = [{pipeline_mode = #tpu.pipeline_mode<synchronous>, transform_indices = @transform_0, window_bounds = array<i64: 2, 1, 32>}, {transform_indices = @transform_1, window_bounds = array<i64: 2, 8, 32>}, {transform_indices = @transform_2, window_bounds = array<i64: 2, 8, 32>}]} {
    %c0 = arith.constant 0 : index
    %c0_0 = arith.constant 0 : index
    %c0_1 = arith.constant 0 : index
    %0 = vector.load %arg2[%c0, %c0_0, %c0_1] : memref<2x8x32xf32, #tpu.memory_space<vmem>>, vector<2x8x32xf32>
    %c0_2 = arith.constant 0 : index
    %c0_3 = arith.constant 0 : index
    %c0_4 = arith.constant 0 : index
    %1 = vector.load %arg1[%c0_2, %c0_3, %c0_4] : memref<2x1x32xf32, #tpu.memory_space<vmem>>, vector<2x1x32xf32>
    %2 = vector.broadcast %1 : vector<2x1x32xf32> to vector<2x8x32xf32>
    %3 = arith.mulf %0, %2 : vector<2x8x32xf32>
    %c0_5 = arith.constant 0 : index
    %c0_6 = arith.constant 0 : index
    %c0_7 = arith.constant 0 : index
    %4 = vector.load %arg3[%c0_5, %c0_6, %c0_7] : memref<2x8x32xf32, #tpu.memory_space<vmem>>, vector<2x8x32xf32>
    tpu.vector_store %arg3[%c0_5, %c0_6, %c0_7], %3 {strides = array<i32>} : memref<2x8x32xf32, #tpu.memory_space<vmem>>, vector<2x8x32xf32>,
    return
  }
  func.func @transform_0(%arg0: i32) -> (i32, i32, i32) {
    %c0_i32 = arith.constant 0 : i32
    %c0_i32_0 = arith.constant 0 : i32
    %c0_i32_1 = arith.constant 0 : i32
    %c0_i32_2 = arith.constant 0 : i32
    return %c0_i32, %c0_i32_0, %c0_i32_1 : i32, i32, i32
  }
  func.func @transform_1(%arg0: i32) -> (i32, i32, i32) {
    %c0_i32 = arith.constant 0 : i32
    %c0_i32_0 = arith.constant 0 : i32
    %c0_i32_1 = arith.constant 0 : i32
    return %c0_i32, %arg0, %c0_i32_0 : i32, i32, i32
  }
  func.func @transform_2(%arg0: i32) -> (i32, i32, i32) {
    %c0_i32 = arith.constant 0 : i32
    %c0_i32_0 = arith.constant 0 : i32
    %c0_i32_1 = arith.constant 0 : i32
    return %c0_i32, %arg0, %c0_i32_0 : i32, i32, i32
  }
}

</mosaic_0001>

<bundles_post_ra>
// kernel: tpu_custom_call.1
= control target key start
LH: loop header
LB: loop body
LE: loop exit
PB: predicated region body
PF: predicated region fallthrough
CT: control target
= control target key end

     0   :  { %7 = vsyncpa [#allocation3], 0  ;;  %s224_s0 = inlined_call_operand.hbm [shape: f32[2,1,32], index: 0, kind: input, shape index: {}]   ;;  %s225_s1 = inlined_call_operand.hbm [shape: f32[2,8,32], index: 1, kind: input, shape index: {}]   ;;  %s226_s2 = inlined_call_operand.hbm [shape: f32[2,8,32], index: 2, kind: output, shape index: {}]  }
   0x1   :  { %8 = vsyncpa [#allocation6], 0 }
   0x2   :  { %9 = vsyncpa [#allocation4], 0  ;;  %s160_s9 = smov [#allocation2]   ;;  %s88_s13 = scalar_lea.hbm %s224_s0, 32 }
   0x3   :  { %s15_s10 = sshll.u32 %s160_s9, 4  ;;  %p89_p0 = scmp.ne.s32.totalorder %s224_s0, %s88_s13  ;;  %s16_s10 = int_to_ptr.vmem [resolvable:$true] %s15_s10 }
   0x4   :  { %p92_p1 = scmp.lt.u32.totalorder %s88_s13, %s224_s0 }
   0x6   :  { %p94_p2 = pnand %p92_p1, %p89_p0 }
   0x8   :  { %97 = shalt.err (!%p94_p2)
}
   0x9   :  { %s98_s18 = scalar_lea.vmem %s16_s10, 32  ;;  %p103_p4 = scmp.lt.s32.totalorder %s16_s10, %s16_s10 }
   0xa   :  { %p99_p3 = scmp.ne.s32.totalorder %s16_s10, %s98_s18  ;;  %p104_p5 = scmp.lt.s32.totalorder %s98_s18, %s98_s18 }
   0xc   :  { %p105_p6 = por %p104_p5, %p103_p4 }
   0xe   :  { %p106_p7 = pnand %p105_p6, %p99_p3 }
  0x10   :  { %109 = shalt.err (!%p106_p7)
}
  0x11   :  { %s161_s19 = smov 16   ;;  %s162_s20 = smov 1  }
  0x12   :  { %21 = dma.hbm_to_vmem [thread:$0]  %s224_s0, 32, %s16_s10, [#allocation3], %s161_s19, %s161_s19, %s162_s20  }
  0x13   :  { %s163_s23 = smov [#allocation5]   ;;  %s110_s27 = scalar_lea.hbm %s225_s1, 256 }
  0x14   :  { %s27_s24 = sshll.u32 %s163_s23, 4  ;;  %p111_p8 = scmp.ne.s32.totalorder %s225_s1, %s110_s27  ;;  %s28_s24 = int_to_ptr.vmem [resolvable:$true] %s27_s24 }
  0x15   :  { %p114_p9 = scmp.lt.u32.totalorder %s110_s27, %s225_s1 }
  0x17   :  { %p116_p10 = pnand %p114_p9, %p111_p8 }
  0x19   :  { %119 = shalt.err (!%p116_p10)
}
  0x1a   :  { %s120_s4 = scalar_lea.vmem %s28_s24, 256  ;;  %p125_p12 = scmp.lt.s32.totalorder %s28_s24, %s28_s24 }
  0x1b   :  { %p121_p11 = scmp.ne.s32.totalorder %s28_s24, %s120_s4  ;;  %p126_p13 = scmp.lt.s32.totalorder %s120_s4, %s120_s4 }
  0x1d   :  { %p127_p0 = por %p126_p13, %p125_p12 }
  0x1f   :  { %p128_p1 = pnand %p127_p0, %p121_p11 }
  0x21   :  { %131 = shalt.err (!%p128_p1)
}
  0x22   :  { %s164_s0 = smov 128   ;;  %s165_s5 = smov 8  }
  0x23   :  { %33 = dma.hbm_to_vmem [thread:$0]  %s225_s1, 256, %s28_s24, [#allocation6], %s164_s0, %s164_s0, %s165_s5  }
  0x24   :  { %154 = dma.done.wait [#allocation3], 32  }
  0x25   :  { %155 = vsyncadd [#allocation3], 4294967264 }
  0x26   :  { %156 = dma.done.wait [#allocation6], 256  }
  0x27   :  { %157 = vsyncadd [#allocation6], 4294967040  ;;  %s166_s8 = smov [#allocation7]   ;;  %v40_v0 = vld [vmem:[#allocation5] sm:$0xff]  ;;  %v79_v1 = vld [vmem:[#allocation2] ss:$0 sm:$0xff] }
  0x28   :  { %s66_s9 = sshll.u32 %s166_s8, 4  ;;  %vm58_vm0 = vcmask 261120   ;;  %v41_v2 = vld [vmem:[#allocation5 + $0x8] sm:$0xff]  ;;  %v56_v3 = vmul.f32 %v79_v1, %v40_v0  ;;  %v80_v4 = vld [vmem:[#allocation2 + $0x1] ss:$0 sm:$0xff]  ;;  %s67_s9 = int_to_ptr.vmem [resolvable:$true] %s66_s9 }
  0x29   :  { %v57_v5 = vmul.f32 %v80_v4, %v41_v2  ;;  %s132_s10 = scalar_lea.vmem %s67_s9, 256  ;;  %p137_p3 = scmp.lt.s32.totalorder %s67_s9, %s67_s9 }
  0x2a   :  { %59 = vst.msk [vmem:[#allocation7] sm:$0xff] %vm58_vm0, %v56_v3  ;;  %p133_p2 = scmp.ne.s32.totalorder %s67_s9, %s132_s10  ;;  %p138_p4 = scmp.lt.s32.totalorder %s132_s10, %s132_s10 }
  0x2b   :  { %60 = vst.msk [vmem:[#allocation7 + $0x8] sm:$0xff] %vm58_vm0, %v57_v5 }
  0x2c   :  { %p139_p5 = por %p138_p4, %p137_p3 }
  0x2e   :  { %p140_p6 = pnand %p139_p5, %p133_p2 }
  0x30   :  { %143 = shalt.err (!%p140_p6)
}
  0x31   :  { %s144_s12 = scalar_lea.hbm %s226_s2, 256 }
  0x32   :  { %p145_p7 = scmp.ne.s32.totalorder %s226_s2, %s144_s12  ;;  %p148_p8 = scmp.lt.u32.totalorder %s144_s12, %s226_s2 }
  0x34   :  { %p150_p9 = pnand %p148_p8, %p145_p7 }
  0x36   :  { %153 = shalt.err (!%p150_p9)
}
  0x37   :  { %72 = dma.vmem_to_hbm [thread:$0]  %s67_s9, 256, %s226_s2, [#allocation4], %s164_s0, %s164_s0, %s165_s5  }
  0x38   :  { %158 = dma.done.wait [#allocation4], 256  }
  0x39   :  { %159 = vsyncadd [#allocation4], 4294967040 }
  0x3a   :  { %76 = vsyncpa [#allocation3], 1 }
  0x3b   :  { %77 = vsyncpa [#allocation6], 1 }
  0x3c   :  { %78 = vsyncpa [#allocation4], 1 }

</bundles_post_ra>
